<compile_context>
chip_gen: v7x
topology: tpu7x:2x2x1
jax: 0.10.0
libtpu: 0.0.40
codegen_flags: <defaults>
</compile_context>

<pallas_src>
import jax
import jax.numpy as jnp
from jax.experimental import pallas as pl
from jax.experimental.pallas import tpu as pltpu

NUM_CLASSES = 23


def _round_up(x, m):
    return ((x + m - 1) // m) * m


def _max_tile_pixels():
    """Per-generation pixel-tile cap, sized against the scoped-VMEM default.

    Output block = 23 * tn * 4 B, double-buffered by Pallas, plus a small
    int32 input block:
      * v6e / v7x (32 MiB scoped default): tn = 131072 px  (~11.5 MiB block,
        ~24 MiB double-buffered; well under v7x's 64 MiB physical VMEM).
      * v5e / unknown (16 MiB scoped default): tn = 65536 px (~5.75 MiB block).
    """
    try:
        kind = jax.devices()[0].device_kind.lower()
    except Exception:
        return 65536
    if "v6" in kind or "v7" in kind or "7x" in kind:
        return 131072
    return 65536


def _choose_tiling(n, max_tile):
    """Pick (tn, grid_n, n_pad) for the flattened pixel axis.

    Goals (per perf review):
      * tn is a multiple of 128 (lane-dense, unmasked vst).
      * When n is 128-aligned, tn divides n exactly so n_pad == n and the
        wrapper slice/reshape is metadata-only (no extra full-slab copy).
      * grid_n >= 2 whenever possible so the parallel grid axis can be
        sharded across both TensorCores on v7x (no effect on 1-TC chips).
    """
    n128 = _round_up(n, 128)
    max_blocks = max(1, max_tile // 128)
    min_grid = 2 if n128 >= 256 else 1

    if n % 128 == 0:
        nb = n // 128
        # Largest divisor of nb that fits the tile cap and keeps grid_n >= min_grid.
        for d in range(min(nb, max_blocks), 0, -1):
            if nb % d == 0 and (nb // d >= min_grid or nb < min_grid):
                return d * 128, nb // d, n

    # Ragged case: derive tn from grid_n so padding is < one 128-lane block
    # per tile rather than a whole tile of dead columns.
    grid_n = max(min_grid, -(-n128 // (max_blocks * 128)))
    grid_n = min(grid_n, n128 // 128)
    grid_n = max(grid_n, 1)
    tn = _round_up(-(-n // grid_n), 128)
    grid_n = -(-n // tn)
    return tn, grid_n, tn * grid_n


def _onehot_kernel(t_ref, o_ref):
    # t_ref: (1, tn) int32 labels (flattened pixels); o_ref: (C, tn) float32.
    t = t_ref[...]
    # target_image[target_image == -1] = 1
    t = jnp.where(t == -1, jnp.int32(1), t)
    c = o_ref.shape[0]
    # Per-class index on the sublane axis only; the compare broadcasts along
    # lanes, avoiding a full (C, tn) int32 iota intermediate each grid step.
    class_idx = jax.lax.broadcasted_iota(jnp.int32, (c, 1), 0)
    o_ref[...] = (t == class_idx).astype(jnp.float32)


def _build_prediction(target_image):
    """Run the one-hot kernel once and return the (1, C, H, W) float32 tensor."""
    target_image = target_image.astype(jnp.int32)
    h, w = target_image.shape
    n = h * w

    tn, grid_n, n_pad = _choose_tiling(n, _max_tile_pixels())

    t_flat = target_image.reshape(-1)
    if n_pad != n:
        # Out-of-range sentinel -> all-zero one-hot columns, sliced off below.
        # TODO(synk): labels outside [-1, 23) silently give all-zero columns
        # instead of raising like torch.nn.functional.one_hot.
        t_flat = jnp.pad(t_flat, (0, n_pad - n), constant_values=NUM_CLASSES)
    t2d = t_flat.reshape(1, n_pad)

    onehot = pl.pallas_call(
        _onehot_kernel,
        out_shape=jax.ShapeDtypeStruct((NUM_CLASSES, n_pad), jnp.float32),
        grid_spec=pl.GridSpec(
            grid=(grid_n,),
            in_specs=[pl.BlockSpec((1, tn), lambda i: (0, i))],
            out_specs=pl.BlockSpec((NUM_CLASSES, tn), lambda i: (0, i)),
        ),
        compiler_params=pltpu.CompilerParams(
            dimension_semantics=("parallel",),
        ),
        cost_estimate=pl.CostEstimate(
            flops=2 * NUM_CLASSES * n_pad,           # compare + select per element
            transcendentals=0,
            bytes_accessed=n_pad * 4 + NUM_CLASSES * n_pad * 4,
        ),
    )

    pred_2d = onehot(t2d)                            # (C, n_pad) float32
    if n_pad != n:
        pred_2d = pred_2d[:, :n]                     # only when padding exists
    pred_chw = pred_2d.reshape(NUM_CLASSES, h, w)    # metadata-only when n_pad == n
    return jnp.expand_dims(pred_chw, 0)              # (1, C, H, W) float32


def make_dummy_segmentation_model(target_image):
    """Builds the 'model': the one-hot prediction is precomputed once here
    (matching PyTorch's __init__); forward just returns the cached result."""
    prediction = jax.block_until_ready(_build_prediction(target_image))

    def forward(x):
        # forward ignores x, exactly like the PyTorch module.
        del x
        return prediction

    return forward


if __name__ == "__main__":
    key = jax.random.PRNGKey(0)
    k_t, k_x = jax.random.split(key)

    H, W = 16, 16
    # Labels in [-1, 23): include some -1 entries to exercise the replacement.
    target_image = jax.random.randint(
        k_t, (H, W), minval=-1, maxval=NUM_CLASSES, dtype=jnp.int32
    )
    # Ignored input x, NCHW like the PyTorch caller would pass.
    x = jax.random.normal(k_x, (2, 3, H, W), dtype=jnp.float32)

    model = make_dummy_segmentation_model(target_image)
    out = model(x)
    out = jax.block_until_ready(out)

    # Reference check in plain JAX (same semantics as the PyTorch module).
    t_fixed = jnp.where(target_image == -1, 1, target_image)
    ref = jax.nn.one_hot(t_fixed, NUM_CLASSES, dtype=jnp.float32)  # (H, W, C)
    ref = jnp.transpose(ref, (2, 0, 1))[None]                      # (1, C, H, W)

    assert out.shape == (1, NUM_CLASSES, H, W), out.shape
    assert out.dtype == jnp.float32
    assert bool(jnp.all(out == ref))
    print("KERNEL_OK")
</pallas_src>

<mosaic_0001>
module attributes {stable_mosaic.version = 11 : i64} {
  func.func @_onehot_kernel(%arg0: i32, %arg1: memref<1x128xi32, #tpu.memory_space<vmem>>, %arg2: memref<23x128xf32, #tpu.memory_space<vmem>>) attributes {dimension_semantics = [#tpu.dimension_semantics<parallel>], iteration_bounds = array<i64: 2>, scalar_prefetch = 0 : i64, scratch_operands = 0 : i64, tpu.core_type = #tpu.core_type<tc>, window_params = [{transform_indices = @transform_0, window_bounds = array<i64: 1, 128>}, {transform_indices = @transform_1, window_bounds = array<i64: 23, 128>}]} {
    %c0 = arith.constant 0 : index
    %c0_0 = arith.constant 0 : index
    %0 = vector.load %arg1[%c0, %c0_0] : memref<1x128xi32, #tpu.memory_space<vmem>>, vector<1x128xi32>
    %c-1_i32 = arith.constant -1 : i32
    %1 = vector.broadcast %c-1_i32 : i32 to vector<1x128xi32>
    %2 = arith.cmpi eq, %0, %1 : vector<1x128xi32>
    %c1_i32 = arith.constant 1 : i32
    %3 = vector.broadcast %c1_i32 : i32 to vector<1x128xi32>
    %4 = arith.select %2, %3, %0 : vector<1x128xi1>, vector<1x128xi32>
    %5 = tpu.iota {dimensions = array<i32: 0>} : vector<23x1xi32>
    %6 = vector.broadcast %4 : vector<1x128xi32> to vector<23x128xi32>
    %7 = vector.broadcast %5 : vector<23x1xi32> to vector<23x128xi32>
    %8 = arith.cmpi eq, %6, %7 : vector<23x128xi32>
    %9 = arith.extui %8 : vector<23x128xi1> to vector<23x128xi32>
    %10 = arith.sitofp %9 : vector<23x128xi32> to vector<23x128xf32>
    %c0_1 = arith.constant 0 : index
    %c0_2 = arith.constant 0 : index
    %11 = vector.load %arg2[%c0_1, %c0_2] : memref<23x128xf32, #tpu.memory_space<vmem>>, vector<23x128xf32>
    tpu.vector_store %arg2[%c0_1, %c0_2], %10 {strides = array<i32>} : memref<23x128xf32, #tpu.memory_space<vmem>>, vector<23x128xf32>,
    return
  }
  func.func @transform_0(%arg0: i32) -> (i32, i32) {
    %c0_i32 = arith.constant 0 : i32
    %c0_i32_0 = arith.constant 0 : i32
    return %c0_i32, %arg0 : i32, i32
  }
  func.func @transform_1(%arg0: i32) -> (i32, i32) {
    %c0_i32 = arith.constant 0 : i32
    %c0_i32_0 = arith.constant 0 : i32
    return %c0_i32, %arg0 : i32, i32
  }
}

</mosaic_0001>

<bundles_post_ra>
// kernel: tpu_custom_call.1
= control target key start
LH: loop header
LB: loop body
LE: loop exit
PB: predicated region body
PF: predicated region fallthrough
CT: control target
= control target key end

     0   :  { %6 = vsyncpa [#allocation3], 0  ;;  %s575_s0 = inlined_call_operand.hbm [shape: s32[1,256], index: 0, kind: input, shape index: {}]   ;;  %s576_s1 = inlined_call_operand.hbm [shape: f32[23,256], index: 1, kind: output, shape index: {}]  }
   0x1   :  { %8 = vsyncpa [#allocation3 + $0x1], 0 }
   0x2   :  { %9 = vsyncpa [#allocation4], 0 }
   0x3   :  { %11 = vsyncpa [#allocation4 + $0x1], 0  ;;  %s411_s6 = smov 0   ;;  %s413_s7 = smov 0  }
   0x4   :  { %s415_s8 = smov 0   ;;  %s417_s9 = smov 0  }
   0x5 LB: > { %s432_s10 = sadd.s32 4294967295, %s393_s9   ;;  %s235_s11 = sadd.s32 4294967294, %s393_s9   ;;  %s393_s9 = sphi %s417_s9, %s591_s9   ;;  %s389_s8 = sphi %s415_s8, %s590_s8   ;;  %s385_s7 = sphi %s413_s7, %s589_s7   ;;  %s381_s6 = sphi %s411_s6, %s588_s6  }
   0x6   : > { %s436_s12 = sadd.s32 1, %s393_s9   ;;  %s24_s13 = sadd.s32 1, %s389_s8 }
   0x7   : > { %s21_s14 = ssub.s32 %s393_s9, %s436_s12  ;;  %p31_p0 = scmp.ne.s32.totalorder %s389_s8, %s385_s7 }
   0x8   : > { %p22_p1 = scmp.eq.s32.totalorder %s21_s14, 0  ;;  %p32_p2 = scmp.eq.s32.totalorder %s393_s9, 0 }
   0x9   : > { %p37_p3 = scmp.ne.s32.totalorder %s385_s7, %s381_s6  ;;  %p38_p4 = scmp.eq.s32.totalorder %s432_s10, 0 }
   0xa   : > { %s448_s15 = scalar_select %p22_p1, %s389_s8, %s24_s13  }
   0xb   : > { %p450_p5 = por %p32_p2, %p31_p0  ;;  %p454_p6 = por %p38_p4, %p37_p3 }
   0xc   : > { %p61_p7 = scmp.eq.s32.totalorder %s432_s10, 1  ;;  %p67_p8 = scmp.eq.s32.totalorder %s235_s11, 1 }
   0xd   : > { %p259_p10 = scmp.lt.s32.totalorder %s393_s9, 2  ;;  %s87_s20 = sand.u32 1, %s389_s8  }
   0xe   : > { %p461_p11 = por %p61_p7, %p31_p0  ;;  %p465_p12 = por %p67_p8, %p37_p3 }
   0xf   : > { %s238_s21 = sshll.u32 %s393_s9, 4  ;;  %s90_s25 = scalar_lea.vmem [#allocation2], %s87_s20 }
  0x10   : > { %s580_s18 = scalar_select %p461_p11, 1, 0 }
  0x11   : > { %s581_s19 = scalar_select %p465_p12, 1, 0 }
  0x12   : > { %s474_s24 = scalar_lea.hbm %s575_s0, %s238_s21  ;;  %s97_s26 = sshll.u32 %s90_s25, 4  ;;  %s476_s26 = int_to_ptr.vmem [resolvable:$true] %s97_s26 }
  0x13   : > { %p480_p13 = pnand %p259_p10, %p450_p5  ;;  %s88_s28 = scalar_lea.sflag [#allocation3], %s87_s20 }
  0x14   : > { %s297_s29 = scalar_lea.hbm %s474_s24, 16  ;;  %s302_s3 = scalar_lea.hbm %s575_s0, 32 }
  0x15   : > { %p298_p2 = scmp.ne.s32.totalorder %s474_s24, %s297_s29  ;;  %p299_p3 = pneg %p480_p13 }
  0x16   : > { %p303_p5 = scmp.lt.u32.totalorder %s474_s24, %s575_s0  ;;  %p304_p8 = scmp.lt.u32.totalorder %s302_s3, %s297_s29 }
  0x17   : > { %p300_p4 = pnand %p299_p3, %p298_p2  ;;  %p306_p9 = scmp.lt.u32.totalorder %s297_s29, %s474_s24 }
  0x18   : > { %p305_p10 = por %p304_p8, %p303_p5 }
  0x19   : > { %p301_p7 = pneg %p300_p4 }
  0x1a   : > { %p307_p0 = por %p306_p9, %p305_p10 }
  0x1c   : > { %p308_p1 = pnand %p307_p0, %p301_p7 }
  0x1e   : > { %311 = shalt.err (!%p308_p1)
}
  0x1f   : > { %s312_s11 = scalar_lea.vmem %s476_s26, 16  ;;  %s395_s13 = smov [#allocation2]  }
  0x20   : > { %p313_p2 = scmp.ne.s32.totalorder %s476_s26, %s312_s11  ;;  %s317_s14 = sshll.u32 %s395_s13, 4  ;;  %s318_s14 = int_to_ptr.vmem [resolvable:$false] %s317_s14 }
  0x21   : > { %s319_s16 = scalar_lea.vmem %s318_s14, 32  ;;  %p320_p11 = scmp.lt.s32.totalorder %s476_s26, %s318_s14 }
  0x22   : > { %p315_p4 = pnand %p313_p2, %p299_p3  ;;  %p321_p5 = scmp.lt.s32.totalorder %s319_s16, %s312_s11 }
  0x24   : > { %p316_p12 = pneg %p315_p4  ;;  %p322_p8 = por %p321_p5, %p320_p11 }
  0x26   : > { %p323_p9 = pnand %p322_p8, %p316_p12 }
  0x28   : > { %326 = shalt.err (!%p323_p9)
}
  0x29   : > { %254 = dma.hbm_to_vmem [thread:$0]  (!%p480_p13), %s474_s24, 16, %s476_s26, %s88_s28  }
  0x2a   : > { %p583_p0 = scmp.lt.s32.totalorder %s393_s9, 3  ;;  %p584_p1 = scmp.ge.s32.totalorder %s393_s9, 1 }
  0x2c   : > { %p103_p3 = pnand %p584_p1, %p583_p0 }
  0x2d   : > { %s516_s20 = sand.u32 (!%p103_p3), 1, %s385_s7  }
  0x2e   : > { %106 = sbr.rel (%p103_p3) target bundleno = 82 (0x52), region = 24  ;;  %s109_s21 = scalar_lea.sflag (!%p103_p3), [#allocation3], %s516_s20 }
  0x2f   : > { %s111_s22 = scalar_lea.vmem (!%p103_p3), [#allocation2], %s516_s20 }
  0x35   : > { %372 = dma.done.wait (%p454_p6), %s109_s21, 16  }
  0x36   : > { %374 = vsyncadd (%p454_p6), %s109_s21, 4294967280  ;;  %v132_v0 = vlaneseq  ;;  %s246_s23 = smul.u32 24, %s516_s20  ;;  %v129_v3 = vld [vmem:[%s111_s22] sm:$0x1]  ;;  %s243_s24 = sshll.u32 %s432_s10, 7  ;;  %v396_v8 = vmov 0.0  }
  0x37   : > { %vm130_vm0 = vcmp.eq.s32.totalorder %v129_v3, 4294967295  ;;  %s529_s17 = scalar_lea.hbm %s576_s1, %s243_s24  ;;  %s153_s10 = scalar_lea.sflag [#allocation4], %s516_s20 }
  0x38   : > { %v133_v1 = vshrl.u32 %v132_v0, 7  ;;  %v131_v6 = vsel %vm130_vm0, 1, %v129_v3  ;;  %s128_s25 = scalar_lea.vmem [#allocation5], %s246_s23  ;;  %p585_p11 = scmp.ne.s32.totalorder %s580_s18, 0 }
  0x39   : > { %s165_s26 = sshll.u32 %s128_s25, 4  ;;  %s397_s30 = smov [#allocation5]   ;;  %s531_s26 = int_to_ptr.vmem [resolvable:$true] %s165_s26 }
  0x3a   : > { %v138_v2 = vsub.s32 0, %v133_v1  ;;  %v134_v4 = vadd.s32 8, %v133_v1  ;;  %v135_v5 = vadd.s32 16, %v133_v1  ;;  %s327_s29 = scalar_lea.vmem %s531_s26, 384  ;;  %s331_s2 = sshll.u32 %s397_s30, 4  ;;  %s332_s2 = int_to_ptr.vmem [resolvable:$false] %s331_s2 }
  0x3b   : > { %p328_p6 = scmp.ne.s32.totalorder %s531_s26, %s327_s29  ;;  %s333_s3 = scalar_lea.vmem %s332_s2, 768 }
  0x3c   : > { %v139_v7 = vrot.slane %v131_v6, %v138_v2  ;;  %p334_p7 = scmp.lt.s32.totalorder %s531_s26, %s332_s2  ;;  %p335_p10 = scmp.lt.s32.totalorder %s333_s3, %s327_s29 }
  0x3d   : > { %p329_p12 = pnand %p328_p6, %p585_p11 }
  0x3e   : > { %vm140_vm1 = vcmp.eq.s32.totalorder %v139_v7, %v133_v1  ;;  %vm141_vm2 = vcmp.eq.s32.totalorder %v139_v7, %v134_v4  ;;  %vm142_vm3 = vcmp.eq.s32.totalorder %v139_v7, %v135_v5  ;;  %p336_p2 = por %p335_p10, %p334_p7 }
  0x3f   : > { %v240_v9 = vsel %vm140_vm1, 1.0, %v396_v8  ;;  %v241_v10 = vsel %vm141_vm2, 1.0, %v396_v8  ;;  %v242_v11 = vsel %vm142_vm3, 1.0, %v396_v8  ;;  %p330_p13 = pneg %p329_p12 }
  0x40   : > { %149 = vst [vmem:[%s128_s25] sm:$0xff] %v240_v9  ;;  %150 = vst [vmem:[%s128_s25 + $0x8] sm:$0xff] %v241_v10 }
  0x41   : > { %151 = vst [vmem:[%s128_s25 + $0x10] sm:$0x7f] %v242_v11  ;;  %p337_p4 = pnand %p336_p2, %p330_p13 }
  0x43   : > { %340 = shalt.err (!%p337_p4)
}
  0x44   : > { %s341_s4 = scalar_lea.hbm %s529_s17, 384  ;;  %s345_s13 = scalar_lea.hbm %s576_s1, 768 }
  0x45   : > { %p342_p5 = scmp.ne.s32.totalorder %s529_s17, %s341_s4  ;;  %p346_p0 = scmp.lt.u32.totalorder %s529_s17, %s576_s1 }
  0x46   : > { %p347_p1 = scmp.lt.u32.totalorder %s345_s13, %s341_s4  ;;  %p349_p6 = scmp.lt.u32.totalorder %s341_s4, %s529_s17 }
  0x47   : > { %p343_p8 = pnand %p342_p5, %p585_p11 }
  0x48   : > { %p348_p3 = por %p347_p1, %p346_p0 }
  0x49   : > { %p344_p9 = pneg %p343_p8 }
  0x4a   : > { %p350_p12 = por %p349_p6, %p348_p3 }
  0x4c   : > { %p351_p13 = pnand %p350_p12, %p344_p9 }
  0x4e   : > { %354 = shalt.err (!%p351_p13)
}
  0x4f   : > { %s398_s21 = smov 128   ;;  %s399_s22 = smov 256  }
  0x50   : > { %s400_s23 = smov 8  }
  0x51   : > { %249 = dma.vmem_to_hbm [thread:$0]  (%p585_p11), %s531_s26, 384, %s529_s17, %s153_s10, %s398_s21, %s399_s22, %s400_s23  }
  0x52 PF: > { %s180_s24 = sand.u32 1, %s381_s6   ;;  %p586_p7 = scmp.ne.s32.totalorder %s581_s19, 0 }
  0x53   : > { %p587_p10 = scmp.ge.s32.totalorder %s393_s9, 2  ;;  %s181_s25 = scalar_lea.sflag [#allocation4], %s180_s24 }
  0x55   : > { %p256_p2 = pnand %p587_p10, %p586_p7 }
  0x57   : > { %376 = dma.done.wait (!%p256_p2), %s181_s25, 384  }
  0x58   : > { %378 = vsyncadd (!%p256_p2), %s181_s25, 4294966912  ;;  %p14_p4 = scmp.ge.s32.totalorder %s436_s12, 4   ;;  %s588_s6 = smov %s385_s7 }
  0x59   : > { %s589_s7 = smov %s389_s8  ;;  %s590_s8 = smov %s448_s15 }
  0x5a   : > { %s591_s9 = smov %s436_s12  ;;  %16 = sbr.rel (!%p14_p4) target bundleno = 5 (0x5), region = 69 }
  0x61   :  { %186 = vsyncpa [#allocation3], 1 }
  0x62   :  { %188 = vsyncpa [#allocation3 + $0x1], 1 }
  0x63   :  { %189 = vsyncpa [#allocation4], 1 }
  0x64   :  { %191 = vsyncpa [#allocation4 + $0x1], 1 }

</bundles_post_ra>
